<compile_context>
chip_gen: v7x
topology: tpu7x:2x2x1
jax: 0.10.0
libtpu: 0.0.40
codegen_flags: <defaults>
</compile_context>

<pallas_src>
import functools
import math

import jax
import jax.numpy as jnp
from jax import lax
from jax.experimental import pallas as pl
from jax.experimental.pallas import tpu as pltpu


def _flash_rel_pos_kernel(q_ref, k_ref, v_ref, o_ref,
                          m_scr, acc_scr, qs_scr, vl_scr, iota_scr,
                          *, scale, exp_dtype):
    kv = pl.program_id(3)
    tk = k_ref.shape[2]
    d = q_ref.shape[3]

    @pl.when(kv == 0)
    def _init():
        m_scr[...] = jnp.full_like(m_scr, -jnp.inf)
        acc_scr[...] = jnp.zeros_like(acc_scr)
        # Hoist the 1/sqrt(D) Q scaling out of the kv loop (constant per sweep).
        qs_scr[...] = q_ref[0, 0] * scale
        # Fill the augmented-RHS scratch with ones; the first D columns are
        # overwritten with the V tile every step, column D stays 1 so the PV
        # matmul also produces the softmax row-sum l.
        vl_scr[...] = jnp.ones(vl_scr.shape, vl_scr.dtype)
        # In-tile bias ramp -(0..tk-1); the per-step tile offset kv*tk is folded
        # into the [tq,1] max/shift vectors below.
        iota_scr[...] = (-lax.broadcasted_iota(jnp.int32, (1, tk), 1)).astype(jnp.float32)

    k = k_ref[0, 0]                                           # [tk, D], input dtype
    vl_scr[:, 0:d] = v_ref[0, 0].astype(vl_scr.dtype)         # bf16 [V | 1] RHS

    # S = (Q/sqrt(D)) @ K^T, f32 accumulation on the MXU; Q/K stay in their input
    # dtype (bf16 inputs -> bf16 matmul, f32 inputs stay exact-but-slower).
    s = lax.dot_general(
        qs_scr[...], k,
        dimension_numbers=(((1,), (1,)), ((), ())),
        preferred_element_type=jnp.float32,
    )                                                         # [tq, tk] f32

    # score_mod: + (q_idx - kv_idx).  +q_idx cancels in the softmax; apply the
    # in-tile -j ramp here and fold the scalar offset kv*tk into max/shift.
    s = s + iota_scr[...]                                     # [tq, tk]
    off = (kv * tk).astype(jnp.float32)

    m_prev = m_scr[...]                                       # [tq, 1]
    m_new = jnp.maximum(m_prev, jnp.max(s, axis=-1, keepdims=True) - off)
    alpha = jnp.exp(m_prev - m_new)                           # [tq, 1] f32
    shift = m_new + off                                       # [tq, 1] f32

    # exp in bf16 on v6e/v7x (bf16 EUP ~2x), f32 elsewhere; P always goes to the
    # MXU in bf16, accumulation stays f32.
    p = jnp.exp((s - shift).astype(exp_dtype)).astype(jnp.bfloat16)   # [tq, tk]

    # Single MXU matmul produces [P @ V | sum(P)] -> fused output / l accumulator.
    acc_scr[...] = alpha * acc_scr[...] + jnp.dot(
        p, vl_scr[...], preferred_element_type=jnp.float32)           # [tq, D+1]
    m_scr[...] = m_new

    @pl.when(kv == pl.num_programs(3) - 1)
    def _finalize():
        acc = acc_scr[...]
        # EUP reciprocal; l >= 1 always (the running-max row contributes exp(0)).
        inv = pl.reciprocal(acc[:, d:d + 1], approx=True)
        o_ref[0, 0] = (acc[:, 0:d] * inv).astype(o_ref.dtype)


def _tpu_kind():
    try:
        return jax.devices()[0].device_kind.lower()
    except Exception:
        return ""


def _pick_tile(n, prefer=(512, 256, 128, 64, 32, 16, 8)):
    # Large tiles amortize per-grid-step overhead and K/V HBM re-streaming; the
    # sublane constraint needs a multiple of 8 (or the full dim).
    for t in prefer:
        if n % t == 0:
            return t
    return n


def _kv_block_spec(tk, D, num_buffers):
    index_map = lambda b, h, i, j: (b, h, j, 0)
    if num_buffers is not None and num_buffers > 2:
        try:
            return pl.BlockSpec((1, 1, tk, D), index_map,
                                pipeline_mode=pl.Buffered(num_buffers))
        except (TypeError, AttributeError):
            pass  # BlockSpec without pipeline_mode support -> default 2 buffers.
    return pl.BlockSpec((1, 1, tk, D), index_map)


def relative_positional_attention(Q, K, V, *, tq=None, tk=None, exp_dtype=None):
    """Q, K, V: [B, H, N, D] -> O: [B, H, N, D]."""
    B, H, N, D = Q.shape
    assert K.shape == (B, H, N, D) and V.shape == (B, H, N, D)
    tq = _pick_tile(N) if tq is None else tq
    tk = _pick_tile(N) if tk is None else tk
    assert N % tq == 0 and N % tk == 0, "sequence length must be divisible by tile sizes"
    # TODO(synk): no masking path -- ragged / non-tile-divisible sequence lengths
    # are unsupported rather than silently wrong.

    kind = _tpu_kind()
    is_v7x = ("v7" in kind) or ("7x" in kind)
    has_bf16_vpu = is_v7x or ("v6" in kind) or ("6e" in kind)
    if exp_dtype is None:
        # bf16 exp ~doubles EUP throughput on v6e/v7x; v5e/older (and unknown
        # backends) keep f32 -- no bf16 elementwise datapath there.
        exp_dtype = jnp.bfloat16 if has_bf16_vpu else jnp.float32

    # Per-chip VMEM budgeting: v5e/v6e have 128 MiB physical (raise the scoped
    # limit, triple-buffer K/V); v7x has 64 MiB (modest limit, double-buffer).
    if is_v7x:
        vmem_limit = 48 * 1024 * 1024
        kv_buffers = 2
    elif has_bf16_vpu or ("v5" in kind):
        vmem_limit = 64 * 1024 * 1024
        kv_buffers = 3 if (N // tk) >= 3 else 2
    else:
        vmem_limit = None
        kv_buffers = 2

    kernel = functools.partial(_flash_rel_pos_kernel,
                               scale=1.0 / math.sqrt(D), exp_dtype=exp_dtype)

    q_spec = pl.BlockSpec((1, 1, tq, D), lambda b, h, i, j: (b, h, i, 0))
    kv_spec = _kv_block_spec(tk, D, kv_buffers)
    o_spec = pl.BlockSpec((1, 1, tq, D), lambda b, h, i, j: (b, h, i, 0))

    # TODO(synk): for D < 128 a head-packed [B, N, H*D] output layout would make
    # the final stores lane-dense; kept the native [B, H, N, D] layout since the
    # one-time output store is amortized over the N/tk kv steps and a packed
    # layout would require full-tensor HBM transposes in the wrapper.
    return pl.pallas_call(
        kernel,
        out_shape=jax.ShapeDtypeStruct((B, H, N, D), Q.dtype),
        grid=(B, H, N // tq, N // tk),
        in_specs=[q_spec, kv_spec, kv_spec],
        out_specs=o_spec,
        scratch_shapes=[
            pltpu.VMEM((tq, 1), jnp.float32),        # running max m
            pltpu.VMEM((tq, D + 1), jnp.float32),    # fused accumulator [P@V | l]
            pltpu.VMEM((tq, D), Q.dtype),            # pre-scaled Q tile
            pltpu.VMEM((tk, D + 1), jnp.bfloat16),   # [V | 1] MXU RHS
            pltpu.VMEM((1, tk), jnp.float32),        # in-tile -kv_idx ramp
        ],
        compiler_params=pltpu.CompilerParams(
            # v7x megacore: B*H*(N//tq) parallel cells are split across the two
            # TensorCores; keep that product >= 2 (shrink tq if B*H is tiny).
            dimension_semantics=("parallel", "parallel", "parallel", "arbitrary"),
            vmem_limit_bytes=vmem_limit,
        ),
    )(Q, K, V)


def _reference(Q, K, V):
    B, H, N, D = Q.shape
    scale = 1.0 / math.sqrt(D)
    s = jnp.einsum("bhnd,bhmd->bhnm",
                   Q.astype(jnp.float32), K.astype(jnp.float32)) * scale
    q_idx = jnp.arange(N, dtype=jnp.float32)[:, None]
    kv_idx = jnp.arange(N, dtype=jnp.float32)[None, :]
    s = s + (q_idx - kv_idx)
    p = jax.nn.softmax(s, axis=-1)
    return jnp.einsum("bhnm,bhmd->bhnd", p, V.astype(jnp.float32)).astype(Q.dtype)


if __name__ == "__main__":
    # Primary small-shape check: B=2, H=4, N=8, D=32 (single kv tile).
    B, H, N, D = 2, 4, 8, 32
    key_q, key_k, key_v = jax.random.split(jax.random.PRNGKey(0), 3)
    Q = jax.random.normal(key_q, (B, H, N, D), dtype=jnp.float32)
    K = jax.random.normal(key_k, (B, H, N, D), dtype=jnp.float32)
    V = jax.random.normal(key_v, (B, H, N, D), dtype=jnp.float32)

    out = jax.block_until_ready(relative_positional_attention(Q, K, V))
    ref = _reference(Q, K, V)
    assert out.shape == (B, H, N, D)
    # Tolerance sized for the bf16 PV-matmul / (chip-dependent) bf16-exp path.
    assert jnp.allclose(out, ref, atol=2e-2, rtol=2e-2), "mismatch vs JAX reference (small)"

    # Secondary check exercising the multi-tile online-softmax / fused-l path.
    B2, H2, N2, D2 = 1, 2, 256, 32
    key_q2, key_k2, key_v2 = jax.random.split(jax.random.PRNGKey(1), 3)
    Q2 = jax.random.normal(key_q2, (B2, H2, N2, D2), dtype=jnp.float32)
    K2 = jax.random.normal(key_k2, (B2, H2, N2, D2), dtype=jnp.float32)
    V2 = jax.random.normal(key_v2, (B2, H2, N2, D2), dtype=jnp.float32)

    out2 = jax.block_until_ready(
        relative_positional_attention(Q2, K2, V2, tq=64, tk=64))
    ref2 = _reference(Q2, K2, V2)
    assert jnp.allclose(out2, ref2, atol=2e-2, rtol=2e-2), "mismatch vs JAX reference (tiled)"

    print("KERNEL_OK")
</pallas_src>

<mosaic_0001>
module attributes {stable_mosaic.version = 11 : i64} {
  func.func @_flash_rel_pos_kernel(%arg0: i32, %arg1: i32, %arg2: i32, %arg3: i32, %arg4: memref<1x1x8x32xf32, #tpu.memory_space<vmem>>, %arg5: memref<1x1x8x32xf32, #tpu.memory_space<vmem>>, %arg6: memref<1x1x8x32xf32, #tpu.memory_space<vmem>>, %arg7: memref<1x1x8x32xf32, #tpu.memory_space<vmem>>, %arg8: memref<8x1xf32, #tpu.memory_space<vmem>>, %arg9: memref<8x33xf32, #tpu.memory_space<vmem>>, %arg10: memref<8x32xf32, #tpu.memory_space<vmem>>, %arg11: memref<8x33xbf16, #tpu.memory_space<vmem>>, %arg12: memref<1x8xf32, #tpu.memory_space<vmem>>) attributes {dimension_semantics = [#tpu.dimension_semantics<parallel>, #tpu.dimension_semantics<parallel>, #tpu.dimension_semantics<parallel>, #tpu.dimension_semantics<arbitrary>], iteration_bounds = array<i64: 2, 4, 1, 1>, scalar_prefetch = 0 : i64, scratch_operands = 5 : i64, tpu.core_type = #tpu.core_type<tc>, window_params = [{transform_indices = @transform_0, window_bounds = array<i64: 1, 1, 8, 32>}, {transform_indices = @transform_1, window_bounds = array<i64: 1, 1, 8, 32>}, {transform_indices = @transform_2, window_bounds = array<i64: 1, 1, 8, 32>}, {transform_indices = @transform_3, window_bounds = array<i64: 1, 1, 8, 32>}]} {
    %c0_i32 = arith.constant 0 : i32
    %0 = arith.cmpi eq, %arg3, %c0_i32 : i32
    %1 = arith.extui %0 : i1 to i32
    %c0_i32_0 = arith.constant 0 : i32
    %2 = arith.cmpi ne, %1, %c0_i32_0 : i32
    scf.if %2 {
      %cst_28 = arith.constant 0xFF800000 : f32
      %41 = vector.broadcast %cst_28 : f32 to vector<8x1xf32>
      %c0_29 = arith.constant 0 : index
      %c0_30 = arith.constant 0 : index
      %42 = vector.load %arg8[%c0_29, %c0_30] : memref<8x1xf32, #tpu.memory_space<vmem>>, vector<8x1xf32>
      tpu.vector_store %arg8[%c0_29, %c0_30], %41 {strides = array<i32>} : memref<8x1xf32, #tpu.memory_space<vmem>>, vector<8x1xf32>,
      %cst_31 = arith.constant 0.000000e+00 : f32
      %43 = vector.broadcast %cst_31 : f32 to vector<8x33xf32>
      %c0_32 = arith.constant 0 : index
      %c0_33 = arith.constant 0 : index
      %44 = vector.load %arg9[%c0_32, %c0_33] : memref<8x33xf32, #tpu.memory_space<vmem>>, vector<8x33xf32>
      tpu.vector_store %arg9[%c0_32, %c0_33], %43 {strides = array<i32>} : memref<8x33xf32, #tpu.memory_space<vmem>>, vector<8x33xf32>,
      %c0_34 = arith.constant 0 : index
      %c0_35 = arith.constant 0 : index
      %c0_36 = arith.constant 0 : index
      %c0_37 = arith.constant 0 : index
      %45 = vector.load %arg4[%c0_34, %c0_35, %c0_36, %c0_37] : memref<1x1x8x32xf32, #tpu.memory_space<vmem>>, vector<1x1x8x32xf32>
      %46 = vector.shape_cast %45 : vector<1x1x8x32xf32> to vector<8x32xf32>
      %cst_38 = arith.constant 0.176776692 : f32
      %47 = vector.broadcast %cst_38 : f32 to vector<8x32xf32>
      %48 = arith.mulf %46, %47 : vector<8x32xf32>
      %c0_39 = arith.constant 0 : index
      %c0_40 = arith.constant 0 : index
      %49 = vector.load %arg10[%c0_39, %c0_40] : memref<8x32xf32, #tpu.memory_space<vmem>>, vector<8x32xf32>
      tpu.vector_store %arg10[%c0_39, %c0_40], %48 {strides = array<i32>} : memref<8x32xf32, #tpu.memory_space<vmem>>, vector<8x32xf32>,
      %cst_41 = arith.constant 1.000000e+00 : bf16
      %50 = vector.broadcast %cst_41 : bf16 to vector<8x33xbf16>
      %c0_42 = arith.constant 0 : index
      %c0_43 = arith.constant 0 : index
      %51 = vector.load %arg11[%c0_42, %c0_43] : memref<8x33xbf16, #tpu.memory_space<vmem>>, vector<8x33xbf16>
      tpu.vector_store %arg11[%c0_42, %c0_43], %50 {strides = array<i32>} : memref<8x33xbf16, #tpu.memory_space<vmem>>, vector<8x33xbf16>,
      %52 = tpu.iota {dimensions = array<i32: 1>} : vector<1x8xi32>
      %c0_i32_44 = arith.constant 0 : i32
      %53 = vector.broadcast %c0_i32_44 : i32 to vector<1x8xi32>
      %54 = arith.subi %53, %52 : vector<1x8xi32>
      %55 = arith.sitofp %54 : vector<1x8xi32> to vector<1x8xf32>
      %c0_45 = arith.constant 0 : index
      %c0_46 = arith.constant 0 : index
      %56 = vector.load %arg12[%c0_45, %c0_46] : memref<1x8xf32, #tpu.memory_space<vmem>>, vector<1x8xf32>
      tpu.vector_store %arg12[%c0_45, %c0_46], %55 {strides = array<i32>} : memref<1x8xf32, #tpu.memory_space<vmem>>, vector<1x8xf32>,
    } else {
    }
    %c0 = arith.constant 0 : index
    %c0_1 = arith.constant 0 : index
    %c0_2 = arith.constant 0 : index
    %c0_3 = arith.constant 0 : index
    %3 = vector.load %arg5[%c0, %c0_1, %c0_2, %c0_3] : memref<1x1x8x32xf32, #tpu.memory_space<vmem>>, vector<1x1x8x32xf32>
    %4 = vector.shape_cast %3 : vector<1x1x8x32xf32> to vector<8x32xf32>
    %c0_4 = arith.constant 0 : index
    %c0_5 = arith.constant 0 : index
    %c0_6 = arith.constant 0 : index
    %c0_7 = arith.constant 0 : index
    %5 = vector.load %arg6[%c0_4, %c0_5, %c0_6, %c0_7] : memref<1x1x8x32xf32, #tpu.memory_space<vmem>>, vector<1x1x8x32xf32>
    %6 = vector.shape_cast %5 : vector<1x1x8x32xf32> to vector<8x32xf32>
    %7 = arith.truncf %6 : vector<8x32xf32> to vector<8x32xbf16>
    %c0_8 = arith.constant 0 : index
    %c0_9 = arith.constant 0 : index
    %8 = vector.load %arg11[%c0_8, %c0_9] : memref<8x33xbf16, #tpu.memory_space<vmem>>, vector<8x32xbf16>
    tpu.vector_store %arg11[%c0_8, %c0_9], %7 {strides = array<i32>} : memref<8x33xbf16, #tpu.memory_space<vmem>>, vector<8x32xbf16>,
    %c0_10 = arith.constant 0 : index
    %c0_11 = arith.constant 0 : index
    %9 = vector.load %arg10[%c0_10, %c0_11] : memref<8x32xf32, #tpu.memory_space<vmem>>, vector<8x32xf32>
    %cst = arith.constant dense<0.000000e+00> : vector<8x8xf32>
    %10 = tpu.matmul %9, %4, %cst {dimension_numbers = #tpu.dot_dimension_numbers<[1], [1], [0], [0], [0, 0, 1, 0], [], []>} : vector<8x32xf32>, vector<8x32xf32>, vector<8x8xf32> -> vector<8x8xf32>
    %c0_12 = arith.constant 0 : index
    %c0_13 = arith.constant 0 : index
    %11 = vector.load %arg12[%c0_12, %c0_13] : memref<1x8xf32, #tpu.memory_space<vmem>>, vector<1x8xf32>
    %12 = vector.broadcast %11 : vector<1x8xf32> to vector<8x8xf32>
    %13 = arith.addf %10, %12 : vector<8x8xf32>
    %c8_i32 = arith.constant 8 : i32
    %14 = arith.muli %arg3, %c8_i32 : i32
    %15 = arith.sitofp %14 : i32 to f32
    %c0_14 = arith.constant 0 : index
    %c0_15 = arith.constant 0 : index
    %16 = vector.load %arg8[%c0_14, %c0_15] : memref<8x1xf32, #tpu.memory_space<vmem>>, vector<8x1xf32>
    %cst_16 = arith.constant dense<0xFF800000> : vector<8xf32>
    %17 = vector.multi_reduction <maximumf>, %13, %cst_16 [1] : vector<8x8xf32> to vector<8xf32>
    %18 = vector.shape_cast %17 : vector<8xf32> to vector<8x1xf32>
    %19 = vector.broadcast %15 : f32 to vector<8x1xf32>
    %20 = arith.subf %18, %19 : vector<8x1xf32>
    %21 = arith.maximumf %16, %20 : vector<8x1xf32>
    %22 = arith.subf %16, %21 : vector<8x1xf32>
    %23 = math.exp %22 : vector<8x1xf32>
    %24 = vector.broadcast %15 : f32 to vector<8x1xf32>
    %25 = arith.addf %21, %24 : vector<8x1xf32>
    %26 = vector.broadcast %25 : vector<8x1xf32> to vector<8x8xf32>
    %27 = arith.subf %13, %26 : vector<8x8xf32>
    %28 = math.exp %27 : vector<8x8xf32>
    %29 = arith.truncf %28 : vector<8x8xf32> to vector<8x8xbf16>
    %c0_17 = arith.constant 0 : index
    %c0_18 = arith.constant 0 : index
    %30 = vector.load %arg9[%c0_17, %c0_18] : memref<8x33xf32, #tpu.memory_space<vmem>>, vector<8x33xf32>
    %31 = vector.broadcast %23 : vector<8x1xf32> to vector<8x33xf32>
    %32 = arith.mulf %31, %30 : vector<8x33xf32>
    %c0_19 = arith.constant 0 : index
    %c0_20 = arith.constant 0 : index
    %33 = vector.load %arg11[%c0_19, %c0_20] : memref<8x33xbf16, #tpu.memory_space<vmem>>, vector<8x33xbf16>
    %cst_21 = arith.constant dense<0.000000e+00> : vector<8x33xf32>
    %34 = tpu.matmul %29, %33, %cst_21 {dimension_numbers = #tpu.dot_dimension_numbers<[1], [0], [0], [1], [0, 0, 1, 1], [], []>} : vector<8x8xbf16>, vector<8x33xbf16>, vector<8x33xf32> -> vector<8x33xf32>
    %35 = arith.addf %32, %34 : vector<8x33xf32>
    %c0_22 = arith.constant 0 : index
    %c0_23 = arith.constant 0 : index
    %36 = vector.load %arg9[%c0_22, %c0_23] : memref<8x33xf32, #tpu.memory_space<vmem>>, vector<8x33xf32>
    tpu.vector_store %arg9[%c0_22, %c0_23], %35 {strides = array<i32>} : memref<8x33xf32, #tpu.memory_space<vmem>>, vector<8x33xf32>,
    %c0_24 = arith.constant 0 : index
    %c0_25 = arith.constant 0 : index
    %37 = vector.load %arg8[%c0_24, %c0_25] : memref<8x1xf32, #tpu.memory_space<vmem>>, vector<8x1xf32>
    tpu.vector_store %arg8[%c0_24, %c0_25], %21 {strides = array<i32>} : memref<8x1xf32, #tpu.memory_space<vmem>>, vector<8x1xf32>,
    %c0_i32_26 = arith.constant 0 : i32
    %38 = arith.cmpi eq, %arg3, %c0_i32_26 : i32
    %39 = arith.extui %38 : i1 to i32
    %c0_i32_27 = arith.constant 0 : i32
    %40 = arith.cmpi ne, %39, %c0_i32_27 : i32
    scf.if %40 {
      %c0_28 = arith.constant 0 : index
      %c0_29 = arith.constant 0 : index
      %41 = vector.load %arg9[%c0_28, %c0_29] : memref<8x33xf32, #tpu.memory_space<vmem>>, vector<8x33xf32>
      %42 = vector.extract_strided_slice %41 {offsets = [0, 32], sizes = [8, 1], strides = [1, 1]} : vector<8x33xf32> to vector<8x1xf32>
      %43 = tpu.reciprocal %42 {approx = true} : vector<8x1xf32> -> vector<8x1xf32>
      %44 = vector.extract_strided_slice %41 {offsets = [0, 0], sizes = [8, 32], strides = [1, 1]} : vector<8x33xf32> to vector<8x32xf32>
      %45 = vector.broadcast %43 : vector<8x1xf32> to vector<8x32xf32>
      %46 = arith.mulf %44, %45 : vector<8x32xf32>
      %c0_30 = arith.constant 0 : index
      %c0_31 = arith.constant 0 : index
      %c0_32 = arith.constant 0 : index
      %c0_33 = arith.constant 0 : index
      %47 = vector.load %arg7[%c0_30, %c0_31, %c0_32, %c0_33] : memref<1x1x8x32xf32, #tpu.memory_space<vmem>>, vector<1x1x8x32xf32>
      %48 = vector.shape_cast %47 : vector<1x1x8x32xf32> to vector<8x32xf32>
      %49 = vector.shape_cast %46 : vector<8x32xf32> to vector<1x1x8x32xf32>
      tpu.vector_store %arg7[%c0_30, %c0_31, %c0_32, %c0_33], %49 {strides = array<i32>} : memref<1x1x8x32xf32, #tpu.memory_space<vmem>>, vector<1x1x8x32xf32>,
    } else {
    }
    return
  }
  func.func @transform_0(%arg0: i32, %arg1: i32, %arg2: i32, %arg3: i32) -> (i32, i32, i32, i32) {
    %c0_i32 = arith.constant 0 : i32
    %c0_i32_0 = arith.constant 0 : i32
    return %arg0, %arg1, %arg2, %c0_i32 : i32, i32, i32, i32
  }
  func.func @transform_1(%arg0: i32, %arg1: i32, %arg2: i32, %arg3: i32) -> (i32, i32, i32, i32) {
    %c0_i32 = arith.constant 0 : i32
    %c0_i32_0 = arith.constant 0 : i32
    return %arg0, %arg1, %arg3, %c0_i32 : i32, i32, i32, i32
  }
  func.func @transform_2(%arg0: i32, %arg1: i32, %arg2: i32, %arg3: i32) -> (i32, i32, i32, i32) {
    %c0_i32 = arith.constant 0 : i32
    %c0_i32_0 = arith.constant 0 : i32
    return %arg0, %arg1, %arg3, %c0_i32 : i32, i32, i32, i32
  }
  func.func @transform_3(%arg0: i32, %arg1: i32, %arg2: i32, %arg3: i32) -> (i32, i32, i32, i32) {
    %c0_i32 = arith.constant 0 : i32
    %c0_i32_0 = arith.constant 0 : i32
    return %arg0, %arg1, %arg2, %c0_i32 : i32, i32, i32, i32
  }
}

</mosaic_0001>

<bundles_post_ra>
// kernel: tpu_custom_call.1
= control target key start
LH: loop header
LB: loop body
LE: loop exit
PB: predicated region body
PF: predicated region fallthrough
CT: control target
= control target key end

     0   :  { %s1340_s0 = inlined_call_operand.hbm [shape: f32[2,4,8,32], index: 0, kind: input, shape index: {}]   ;;  %s1341_s1 = inlined_call_operand.hbm [shape: f32[2,4,8,32], index: 1, kind: input, shape index: {}]   ;;  %s1342_s2 = inlined_call_operand.hbm [shape: f32[2,4,8,32], index: 2, kind: input, shape index: {}]   ;;  %s1343_s3 = inlined_call_operand.hbm [shape: f32[2,4,8,32], index: 3, kind: output, shape index: {}]  }
   0x1   :  { %1353 = sst [smem:[#allocation23_spill]] %s1341_s1 }
   0x2   :  { %8 = vsyncpa [#allocation8], 0 }
   0x3   :  { %10 = vsyncpa [#allocation8 + $0x1], 0 }
   0x4   :  { %11 = vsyncpa [#allocation11], 0 }
   0x5   :  { %13 = vsyncpa [#allocation11 + $0x1], 0 }
   0x6   :  { %14 = vsyncpa [#allocation9], 0 }
   0x7   :  { %16 = vsyncpa [#allocation9 + $0x1], 0  ;;  %s1044_s12 = smov 0   ;;  %s1046_s13 = smov 0  }
   0x8   :  { %s1048_s14 = smov 0   ;;  %s1050_s15 = smov 0  }
   0x9   :  { %s1052_s16 = smov 0   ;;  %s1054_s17 = smov 0  }
   0xa   :  { %s1056_s18 = smov 0   ;;  %s1058_s19 = smov 0  }
   0xb LB: > { %1354 = sst [smem:[#allocation17_spill]] %s1004_s17  ;;  %s1085_s20 = sadd.s32 4294967295, %s1012_s19   ;;  %s1012_s19 = sphi %s1058_s19, %s22_s19   ;;  %s1008_s18 = sphi %s1056_s18, %s1381_s18   ;;  %s1004_s17 = sphi %s1054_s17, %s1380_s17   ;;  %s1000_s16 = sphi %s1052_s16, %s1379_s16   ;;  %s996_s15 = sphi %s1050_s15, %s1378_s15   ;;  %s992_s14 = sphi %s1048_s14, %s1384_s14   ;;  %s988_s13 = sphi %s1046_s13, %s1383_s13   ;;  %s984_s12 = sphi %s1044_s12, %s1382_s12  }
   0xc   : > { %1355 = sst [smem:[#allocation18_spill]] %s1008_s18  ;;  %s675_s21 = sadd.s32 4294967294, %s1012_s19  }
   0xd   : > { %s44_s22 = sadd.s32 1, %s1004_s17  ;;  %s48_s23 = sadd.s32 1, %s1008_s18 }
   0xe   : > { %p46_p0 = scmp.ge.s32.totalorder %s44_s22, 4  ;;  %s59_s24 = sadd.s32 1, %s992_s14 }
   0xf   : > { %p66_p1 = scmp.ne.s32.totalorder %s992_s14, %s988_s13  ;;  %p67_p2 = scmp.eq.s32.totalorder %s1012_s19, 0 }
  0x10   : > { %s1386_s22 = smov (%p46_p0, %s44_s22), 0  ;;  %s1388_s23 = smov (!%p46_p0, %s48_s23), %s1008_s18 }
  0x11   : > { %1356 = sst [smem:[#allocation19_spill]] %s1386_s22  ;;  %s53_s25 = ssub.s32 %s1004_s17, %s1386_s22 }
  0x12   : > { %p1099_p3 = por %p67_p2, %p66_p1  ;;  %p50_p4 = scmp.ge.s32.totalorder %s1388_s23, 2 }
  0x13   : > { %p72_p5 = scmp.ne.s32.totalorder %s988_s13, %s984_s12  ;;  %p73_p6 = scmp.eq.s32.totalorder %s1085_s20, 0 }
  0x14   : > { %p160_p7 = scmp.eq.s32.totalorder %s1085_s20, 7  ;;  %s1390_s23 = smov (%p50_p4, %s1388_s23), 0 }
  0x15   : > { %1358 = sst [smem:[#allocation20_spill]] %s1390_s23  ;;  %p1109_p8 = por %p73_p6, %p72_p5 }
  0x16   : > { %p1113_p9 = por %p160_p7, %p66_p1  ;;  %s52_s29 = ssub.s32 %s1008_s18, %s1390_s23 }
  0x17   : > { %s1359_s27 = scalar_select %p1109_p8, 1, 0 }
  0x18   : > { %s1360_s28 = scalar_select %p1113_p9, 1, 0 }
  0x19   : > { %p166_p10 = scmp.eq.s32.totalorder %s675_s21, 7  ;;  %s54_s30 = sor.u32 %s53_s25, %s52_s29 }
  0x1a   : > { %p57_p11 = scmp.eq.s32.totalorder %s54_s30, 0  ;;  %p738_p13 = scmp.lt.s32.totalorder %s1012_s19, 8 }
  0x1b   : > { %p1119_p12 = por %p166_p10, %p72_p5  ;;  %s1344_s5 = sand.u32 1, %s992_s14  }
  0x1c   : > { %s1126_s6 = scalar_select %p57_p11, %s992_s14, %s59_s24  }
  0x1d   : > { %s1361_s4 = scalar_select %p1119_p12, 1, 0 }
  0x1e   : > { %1363 = sst [smem:[#allocation22_spill]] %s1126_s6  ;;  %s1130_s7 = sshll.u32 %s1344_s5, 3 }
  0x1f   : > { %1362 = sst [smem:[#allocation21_spill]] %s1361_s4  ;;  %s679_s8 = sshll.u32 %s1008_s18, 2 }
  0x20   : > { %s196_s9 = sadd.s32 %s1004_s17, %s679_s8  ;;  %p1136_p0 = pnand %p738_p13, %p1099_p3 }
  0x21   : > { %s1140_s11 = sshll.u32 %s196_s9, 7  ;;  %s207_s21 = sand.u32 1, %s1012_s19  }
  0x22   : > { %s1364_s10 = scalar_select %p1136_p0, 1, 0 }
  0x23   : > { %s1365_s1 = sld [smem:[#allocation23_spill]]  ;;  %s211_s30 = scalar_lea.vmem [#allocation10], %s1130_s7 }
  0x24   : > { %s221_s26 = sshll.u32 %s211_s30, 4  ;;  %s1154_s8 = scalar_lea.sflag [#allocation11], %s207_s21  ;;  %s1151_s26 = int_to_ptr.vmem [resolvable:$true] %s221_s26 }
  0x25   : > { %p1160_p4 = pneg %p1136_p0 }
  0x29   : > { %s1147_s24 = scalar_lea.hbm %s1365_s1, %s1140_s11  ;;  %s825_s30 = scalar_lea.hbm %s1365_s1, 1024 }
  0x2a   : > { %s820_s9 = scalar_lea.hbm %s1147_s24, 128  ;;  %p826_p7 = scmp.lt.u32.totalorder %s1147_s24, %s1365_s1 }
  0x2b   : > { %p821_p3 = scmp.ne.s32.totalorder %s1147_s24, %s820_s9  ;;  %p827_p10 = scmp.lt.u32.totalorder %s825_s30, %s820_s9 }
  0x2c   : > { %p829_p13 = scmp.lt.u32.totalorder %s820_s9, %s1147_s24 }
  0x2d   : > { %p823_p5 = pnand %p1160_p4, %p821_p3  ;;  %p828_p11 = por %p827_p10, %p826_p7 }
  0x2f   : > { %p824_p6 = pneg %p823_p5  ;;  %p830_p1 = por %p829_p13, %p828_p11 }
  0x31   : > { %p831_p2 = pnand %p830_p1, %p824_p6 }
  0x33   : > { %834 = shalt.err (!%p831_p2)
}
  0x34   : > { %s835_s21 = scalar_lea.vmem %s1151_s26, 128  ;;  %s1014_s25 = smov [#allocation10]  }
  0x35   : > { %p836_p3 = scmp.ne.s32.totalorder %s1151_s26, %s835_s21  ;;  %s840_s29 = sshll.u32 %s1014_s25, 4  ;;  %s841_s29 = int_to_ptr.vmem [resolvable:$false] %s840_s29 }
  0x36   : > { %s842_s22 = scalar_lea.vmem %s841_s29, 256  ;;  %p843_p9 = scmp.lt.s32.totalorder %s1151_s26, %s841_s29 }
  0x37   : > { %p838_p5 = pnand %p836_p3, %p1160_p4  ;;  %p844_p8 = scmp.lt.s32.totalorder %s842_s22, %s835_s21 }
  0x39   : > { %p839_p12 = pneg %p838_p5  ;;  %p845_p7 = por %p844_p8, %p843_p9 }
  0x3b   : > { %p846_p10 = pnand %p845_p7, %p839_p12 }
  0x3d   : > { %849 = shalt.err (!%p846_p10)
}
  0x3e   : > { %730 = dma.hbm_to_vmem [thread:$0]  (!%p1136_p0), %s1147_s24, 128, %s1151_s26, %s1154_s8  }
  0x3f   : > { %p1367_p1 = scmp.lt.s32.totalorder %s1012_s19, 9  ;;  %p1368_p2 = scmp.ge.s32.totalorder %s1012_s19, 1 }
  0x40   : > { %s1196_s21 = scalar_lea.hbm %s1340_s0, %s1140_s11  ;;  %s190_s25 = scalar_lea.vmem [#allocation7], %s1130_s7 }
  0x41   : > { %p1188_p6 = pnand %p1368_p2, %p1367_p1  ;;  %s200_s29 = sshll.u32 %s190_s25, 4  ;;  %s1199_s29 = int_to_ptr.vmem [resolvable:$true] %s200_s29 }
  0x42   : > { %s1205_s22 = scalar_lea.hbm %s1342_s2, %s1140_s11  ;;  %s1370_s1 = sand.u32 1, %s992_s14  }
  0x43   : > { %s1369_s23 = scalar_select %p1188_p6, 1, 0 }
  0x44   : > { %s187_s18 = scalar_lea.sflag [#allocation8], %s1370_s1  ;;  %s850_s17 = scalar_lea.hbm %s1196_s21, 128 }
  0x45   : > { %p851_p8 = scmp.ne.s32.totalorder %s1196_s21, %s850_s17  ;;  %s855_s6 = scalar_lea.hbm %s1340_s0, 1024 }
  0x46   : > { %p856_p11 = scmp.lt.u32.totalorder %s1196_s21, %s1340_s0  ;;  %p857_p13 = scmp.lt.u32.totalorder %s855_s6, %s850_s17 }
  0x47   : > { %p853_p9 = pnand %p851_p8, %p1160_p4  ;;  %p859_p5 = scmp.lt.u32.totalorder %s850_s17, %s1196_s21 }
  0x48   : > { %p858_p3 = por %p857_p13, %p856_p11 }
  0x49   : > { %p854_p12 = pneg %p853_p9 }
  0x4a   : > { %p860_p7 = por %p859_p5, %p858_p3 }
  0x4c   : > { %p861_p10 = pnand %p860_p7, %p854_p12 }
  0x4e   : > { %864 = shalt.err (!%p861_p10)
}
  0x4f   : > { %s865_s1 = scalar_lea.vmem %s1199_s29, 128  ;;  %s1015_s11 = smov [#allocation7]  }
  0x50   : > { %p866_p1 = scmp.ne.s32.totalorder %s1199_s29, %s865_s1  ;;  %s870_s24 = sshll.u32 %s1015_s11, 4  ;;  %s871_s24 = int_to_ptr.vmem [resolvable:$false] %s870_s24 }
  0x51   : > { %s872_s4 = scalar_lea.vmem %s871_s24, 256  ;;  %p873_p9 = scmp.lt.s32.totalorder %s1199_s29, %s871_s24 }
  0x52   : > { %p868_p2 = pnand %p866_p1, %p1160_p4  ;;  %p874_p6 = scmp.lt.s32.totalorder %s872_s4, %s865_s1 }
  0x54   : > { %p869_p8 = pneg %p868_p2  ;;  %p875_p11 = por %p874_p6, %p873_p9 }
  0x56   : > { %p876_p13 = pnand %p875_p11, %p869_p8 }
  0x58   : > { %879 = shalt.err (!%p876_p13)
}
  0x59   : > { %727 = dma.hbm_to_vmem [thread:$0]  (!%p1136_p0), %s1196_s21, 128, %s1199_s29, %s187_s18  }
  0x5a   : > { %s232_s17 = scalar_lea.vmem [#allocation12], %s1130_s7  ;;  %s880_s26 = scalar_lea.hbm %s1205_s22, 128 }
  0x5b   : > { %s242_s6 = sshll.u32 %s232_s17, 4  ;;  %p881_p12 = scmp.ne.s32.totalorder %s1205_s22, %s880_s26  ;;  %s243_s6 = int_to_ptr.vmem [resolvable:$true] %s242_s6 }
  0x5c   : > { %s885_s25 = scalar_lea.hbm %s1342_s2, 1024  ;;  %p886_p5 = scmp.lt.u32.totalorder %s1205_s22, %s1342_s2 }
  0x5d   : > { %p883_p6 = pnand %p881_p12, %p1160_p4  ;;  %p887_p7 = scmp.lt.u32.totalorder %s885_s25, %s880_s26 }
  0x5e   : > { %p889_p1 = scmp.lt.u32.totalorder %s880_s26, %s1205_s22 }
  0x5f   : > { %p884_p3 = pneg %p883_p6  ;;  %p888_p10 = por %p887_p7, %p886_p5 }
  0x61   : > { %p890_p2 = por %p889_p1, %p888_p10 }
  0x63   : > { %p891_p8 = pnand %p890_p2, %p884_p3 }
  0x65   : > { %894 = shalt.err (!%p891_p8)
}
  0x66   : > { %s895_s18 = scalar_lea.vmem %s243_s6, 128  ;;  %s1016_s7 = smov [#allocation12]  }
  0x67   : > { %p896_p9 = scmp.ne.s32.totalorder %s243_s6, %s895_s18  ;;  %s900_s21 = sshll.u32 %s1016_s7, 4  ;;  %s901_s21 = int_to_ptr.vmem [resolvable:$false] %s900_s21 }
  0x68   : > { %s902_s29 = scalar_lea.vmem %s901_s21, 256  ;;  %p903_p12 = scmp.lt.s32.totalorder %s243_s6, %s901_s21 }
  0x69   : > { %p898_p11 = pnand %p896_p9, %p1160_p4  ;;  %p904_p6 = scmp.lt.s32.totalorder %s902_s29, %s895_s18 }
  0x6b   : > { %p899_p13 = pneg %p898_p11  ;;  %p905_p0 = por %p904_p6, %p903_p12 }
  0x6d   : > { %p906_p5 = pnand %p905_p0, %p899_p13 }
  0x6f   : > { %909 = shalt.err (!%p906_p5)
}
  0x70   : > { %p1371_p7 = scmp.ne.s32.totalorder %s1364_s10, 0  ;;  %p1372_p3 = scmp.ne.s32.totalorder %s1369_s23, 0 }
  0x71   : > { %s1252_s5 = sand.u32 (!%p1372_p3), 1, %s988_s13   ;;  %p1373_p0 = scmp.ne.s32.totalorder (!%p1372_p3), %s1359_s27, 0 }
  0x72   : > { %733 = dma.hbm_to_vmem [thread:$0]  (!%p1371_p7), %s1205_s22, 128, %s243_s6, %s1154_s8  }
  0x73   : > { %251 = sbr.rel (%p1372_p3) target bundleno = 1018 (0x3fa), region = 32  ;;  %s1255_s24 = sshll.u32 (!%p1372_p3), %s1252_s5, 3 }
  0x74   : > { %s254_s4 = scalar_lea.sflag (!%p1372_p3), [#allocation8], %s1252_s5  ;;  %s257_s17 = scalar_lea.vmem (!%p1372_p3), [#allocation7], %s1255_s24 }
  0x7a   : > { %971 = dma.done.wait (%p1373_p0), %s254_s4, 128  }
  0x7b   : > { %973 = vsyncadd (%p1373_p0), %s254_s4, 4294967168  ;;  %s262_s10 = sand.u32 1, %s1085_s20   ;;  %s266_s23 = scalar_lea.vmem [#allocation10], %s1255_s24 }
  0x7c   : > { %s263_s8 = scalar_lea.sflag [#allocation11], %s262_s10 }
  0x7d   : > { %975 = dma.done.wait (%p1373_p0), %s263_s8, 256  }
  0x7e   : > { %977 = vsyncadd (%p1373_p0), %s263_s8, 4294967040  ;;  %vm316_vm0 = vcmask 269312   ;;  %v1017_v0 = vmov 0.0   ;;  %vm1018_vm1 = vmmov 0   ;;  %v324_v1 = vlaneseq  ;;  %v318_v4 = vld [vmem:[%s257_s17] sm:$0xff]  ;;  %v330_v5 = vld [vmem:[%s266_s23] sm:$0xff] }
  0x7f   : > { %317 = vst.msk [vmem:[#allocation3] sm:$0xff] %vm316_vm0, %v1017_v0  ;;  %705 = vmatprep.subr.mxu0 %v1017_v0  ;;  %707 = vmatprep.mubr.msk.f32.mxu0 %vm1018_vm1, %v1017_v0  ;;  %vm328_vm2 = vcmask 57344   ;;  %vm320_vm3 = vcmask 261120   ;;  %v319_v7 = vmul.f32 0.17677669, %v318_v4  ;;  %vm314_vm4 = vcmask 7168  }
  0x80   : > { %710 = vmatprep.subr.bf16.mxu1 %v1017_v0  ;;  %712 = vmatprep.mubr.msk.bf16.mxu1 %vm1018_vm1, %v1017_v0  ;;  %v325_v2 = vand.u32 127, %v324_v1  ;;  %v1019_v9 = vmov -inf   ;;  %vm423_vm5 = vcmask 64512   ;;  %v1020_v15 = vmov 0   ;;  %s275_s20 = scalar_lea.vmem [#allocation12], %s1255_s24  ;;  %s697_s27 = sshll.u32 %s1000_s16, 2 }
  0x81   : > { %706 = vmatpush3.xpose.msk.msra.mxu0 %vm320_vm3, %v330_v5  ;;  %321 = vst.msk [vmem:[#allocation4] sm:$0xff] %vm320_vm3, %v319_v7  ;;  %810 = vset.pattern.permute.xlu0 %v1020_v15  ;;  %v331_v21 = vld [vmem:[%s275_s20] sm:$0xff]  ;;  %vm322_vm6 = vcmask 265216   ;;  %v1021_v23 = vmov 1065369472   ;;  %vm333_vm7 = vcmask 257024   ;;  %s528_s22 = sadd.s32 %s996_s15, %s697_s27 }
  0x82   : > { %v326_v3 = vsub.s32 0, %v325_v2  ;;  %315 = vst.msk [vmem:[#allocation2] sm:$0xff] %vm314_vm4, %v1019_v9  ;;  %811 = vset.pattern.permute.xlu1 %v1020_v15  ;;  %v332_v22 = vpack.c.bf16 %v331_v21, %v331_v21  ;;  %vm454_vm8 = vcmask 1043456   ;;  %v1022_v32 = vmov 32   ;;  %s698_s6 = sshll.u32 %s528_s22, 7  ;;  %s307_s26 = scalar_lea.vmem [#allocation13], %s1255_s24 }
  0x83   : > { %323 = vst.msk [vmem:[#allocation5] sm:$0xf] %vm322_vm6, %v1021_v23  ;;  %s532_s9 = sshll.u32 %s307_s26, 4  ;;  %s1285_s1 = scalar_lea.hbm %s1343_s3, %s698_s6  ;;  %s1287_s9 = int_to_ptr.vmem [resolvable:$true] %s532_s9 }
  0x84   : > { %v327_v6 = vcvt.s32.f32 %v326_v3  ;;  %334 = vst.msk [vmem:[#allocation5] sm:$0xf] %vm333_vm7, %v332_v22  ;;  %s516_s11 = scalar_lea.sflag [#allocation9], %s1252_s5  ;;  %s910_s16 = scalar_lea.vmem %s1287_s9, 128 }
  0x85   : > { %p911_p4 = scmp.ne.s32.totalorder %s1287_s9, %s910_s16  ;;  %p1374_p10 = scmp.ne.s32.totalorder %s1360_s28, 0 }
  0x86   : > { %329 = vst.msk [vmem:[#allocation6] sm:$0x1] %vm328_vm2, %v327_v6  ;;  %v443_v33 = vld [vmem:[#allocation3] sm:$0xff]  ;;  %s1023_s15 = smov [#allocation13]  }
  0x87   : > { %p912_p1 = pnand %p911_p4, %p1374_p10  ;;  %s914_s18 = sshll.u32 %s1023_s15, 4  ;;  %s915_s18 = int_to_ptr.vmem [resolvable:$false] %s914_s18 }
  0x88   : > { %v335_v8 = vld [vmem:[#allocation4] sm:$0xff]  ;;  %s916_s7 = scalar_lea.vmem %s915_s18, 256  ;;  %p917_p8 = scmp.lt.s32.totalorder %s1287_s9, %s915_s18 }
  0x89   : > { %708 = vmatmul.mubr.msk.f32.vlgmr.msra.gmra.mrb[0].mxu0 %vm320_vm3, %v335_v8  ;;  %v422_v16 = vld [vmem:[#allocation2] sm:$0xff]  ;;  %p913_p2 = pneg %p912_p1  ;;  %p918_p9 = scmp.lt.s32.totalorder %s916_s7, %s910_s16 }
  0x8b   : > { %v450_v24 = vld [vmem:[#allocation5] sm:$0xf]  ;;  %p919_p11 = por %p918_p9, %p917_p8 }
  0x8c   : > { %v456_v25 = vsel %vm454_vm8, %v450_v24, 0 }
  0x8d   : > { %v692_v10 = vld [vmem:[#allocation6] ss:$0 sm:$0xff]  ;;  %711 = vmatpush3.bf16.msra.mxu1 %v456_v25  ;;  %p920_p13 = pnand %p919_p11, %p913_p2 }
 0x15c   : > { %v416_v11 = vpop.f32.mrb[0].mxu0 }
 0x15d   : > { %v417_v12 = vadd.f32 %v692_v10, %v416_v11  ;;  %v709_v13 = vpop.f32.mrb[1].mxu0 }
 0x15f   : > { %v424_v14 = vsel %vm423_vm5, %v417_v12, -inf }
 0x160   : > { %425 = vmax.xlane.f32.xlu0 %v424_v14 }
 0x1ed   : > { %v426_v17 = vpop.xlane.xlu0 %425 }
 0x1ee   : > { %v429_v18 = vmax.f32 %v422_v16, %v426_v17 }
 0x1f0   : > { %v430_v19 = vsub.f32 %v422_v16, %v429_v18  ;;  %502 = vst.msk [vmem:[#allocation2] sm:$0xff] %vm314_vm4, %v429_v18  ;;  %436 = vperm.xlu0 %810, %v429_v18  }
 0x1f2   : > { %v431_v20 = vmul.f32 1.442695, %v430_v19 }
 0x1f4   : > { %814 = vpow2.f32 %v431_v20  ;;  %813 = vset.pattern.permute.xlu0 %v1022_v32 }
 0x1fe   : > { %v815_v26 = vpop.eup %814 }
 0x1ff   : > { %446 = vperm.xlu1 %811, %v815_v26  }
 0x203   : > { %812 = vset.pattern.permute.xlu1 %v1022_v32 }
 0x26f   : > { %v437_v27 = vpop.permute.xlu0 %436 }
 0x270   : > { %v439_v28 = vsub.f32 %v417_v12, %v437_v27 }
 0x272   : > { %v440_v29 = vmul.f32 1.442695, %v439_v28 }
 0x274   : > { %816 = vpow2.f32 %v440_v29 }
 0x27e   : > { %v817_v30 = vpop.eup %816  ;;  %v447_v34 = vpop.permute.xlu1 %446 }
 0x27f   : > { %v442_v31 = vpack.c.bf16 %v817_v30, %v817_v30  ;;  %v449_v35 = vmul.f32 %v447_v34, %v443_v33 }
 0x281   : > { %713 = vmatmul.mubr.msk.bf16.vlgmr.msra.gmra.mrb[0].mxu1 %vm423_vm5, %v442_v31 }
 0x354   : > { %v492_v36 = vpop.f32.mrb[0].mxu1 }
 0x355   : > { %v498_v37 = vadd.f32 %v492_v36, %v449_v35  ;;  %v714_v38 = vpop.f32.mrb[1].mxu1 }
 0x356   : > { %v495_v39 = vpop.f32.mrb[2].mxu1 }
 0x357   : > { %500 = vst.msk [vmem:[#allocation3] sm:$0xff] %vm316_vm0, %v498_v37  ;;  %v715_v40 = vpop.f32.mrb[3].mxu1 }
 0x35e   : > { %v506_v41 = vld [vmem:[#allocation3] sm:$0xff] }
 0x35f   : > { %818 = vrcp.f32 %v506_v41 }
 0x369   : > { %v819_v42 = vpop.eup %818 }
 0x36a   : > { %510 = vperm.xlu1 %812, %v819_v42  }
 0x3e9   : > { %v511_v43 = vpop.permute.xlu1 %510 }
 0x3ea   : > { %v513_v44 = vmul.f32 %v511_v43, %v506_v41 }
 0x3ec   : > { %514 = vst.msk [vmem:[%s307_s26] sm:$0xff] %vm320_vm3, %v513_v44 }
 0x3ed   : > { %923 = shalt.err (!%p920_p13)
}
 0x3ee   : > { %s924_s21 = scalar_lea.hbm %s1285_s1, 128  ;;  %s928_s24 = scalar_lea.hbm %s1343_s3, 1024 }
 0x3ef   : > { %p925_p12 = scmp.ne.s32.totalorder %s1285_s1, %s924_s21  ;;  %p929_p7 = scmp.lt.u32.totalorder %s1285_s1, %s1343_s3 }
 0x3f0   : > { %p930_p3 = scmp.lt.u32.totalorder %s928_s24, %s924_s21  ;;  %p932_p4 = scmp.lt.u32.totalorder %s924_s21, %s1285_s1 }
 0x3f1   : > { %p926_p6 = pnand %p925_p12, %p1374_p10 }
 0x3f2   : > { %p931_p0 = por %p930_p3, %p929_p7 }
 0x3f3   : > { %p927_p5 = pneg %p926_p6 }
 0x3f4   : > { %p933_p1 = por %p932_p4, %p931_p0 }
 0x3f6   : > { %p934_p2 = pnand %p933_p1, %p927_p5 }
 0x3f8   : > { %937 = shalt.err (!%p934_p2)
}
 0x3f9   : > { %722 = dma.vmem_to_hbm [thread:$0]  (%p1374_p10), %s1287_s9, 128, %s1285_s1, %s516_s11  }
 0x3fa PF: > { %s1375_s10 = sld [smem:[#allocation21_spill]]  ;;  %p739_p8 = scmp.ge.s32.totalorder %s1012_s19, 2 }
 0x3fb   : > { %s544_s8 = sand.u32 1, %s984_s12  }
 0x3fc   : > { %s545_s23 = scalar_lea.sflag [#allocation9], %s544_s8 }
 0x400   : > { %p1376_p9 = scmp.ne.s32.totalorder %s1375_s10, 0 }
 0x402   : > { %p735_p11 = pnand %p739_p8, %p1376_p9 }
 0x404   : > { %979 = dma.done.wait (!%p735_p11), %s545_s23, 128  }
 0x405   : > { %981 = vsyncadd (!%p735_p11), %s545_s23, 4294967168  ;;  %s22_s19 = sadd.s32 1, %s1012_s19   ;;  %s1377_s28 = sld [smem:[#allocation22_spill]] }
 0x406   : > { %p19_p13 = scmp.ge.s32.totalorder %s22_s19, 10   ;;  %s1378_s15 = sld [smem:[#allocation17_spill]] }
 0x407   : > { %s1379_s16 = sld [smem:[#allocation18_spill]]  ;;  %s1380_s17 = sld [smem:[#allocation19_spill]] }
 0x408   : > { %s1381_s18 = sld [smem:[#allocation20_spill]]  ;;  %s1382_s12 = smov %s988_s13 }
 0x409   : > { %s1383_s13 = smov %s992_s14  ;;  %21 = sbr.rel (!%p19_p13) target bundleno = 11 (0xb), region = 109 }
 0x40b   : > { %s1384_s14 = smov %s1377_s28 }
 0x410   :  { %550 = vsyncpa [#allocation8], 1 }
 0x411   :  { %552 = vsyncpa [#allocation8 + $0x1], 1 }
 0x412   :  { %553 = vsyncpa [#allocation11], 1 }
 0x413   :  { %555 = vsyncpa [#allocation11 + $0x1], 1 }
 0x414   :  { %556 = vsyncpa [#allocation9], 1 }
 0x415   :  { %558 = vsyncpa [#allocation9 + $0x1], 1 }

</bundles_post_ra>
